<compile_context>
chip_gen: v7x
topology: tpu7x:2x2x1
jax: 0.10.0
libtpu: 0.0.40
codegen_flags: <defaults>
</compile_context>

<pallas_src>
import jax
import jax.numpy as jnp
from jax import lax
from jax.experimental import pallas as pl
from jax.experimental.pallas import tpu as pltpu

NUM_CLASSES = 10
INV_TEN = 0.1  # matches the hard-coded /10.0 in the PyTorch wrapper
               # (kept literal even if the inner model's class count changes,
               #  mirroring the original module)


def _round_up(x, m):
    return ((x + m - 1) // m) * m


def _variance_wrapper_kernel(x_ref, w_ref, b_ref, o_ref):
    # x_ref: (TILE_B, D)  -- batch tile (last grid block may be ragged)
    # w_ref: (C, D)       -- torch.nn.Linear.weight layout, VMEM-resident
    # b_ref: (C, 1)       -- bias, broadcast over lanes (batch)
    # o_ref: (1, TILE_B)  -- lane-dense output slab (batch on lanes)
    x = x_ref[...]
    w = w_ref[...]
    b = b_ref[...]

    # Transposed-orientation matmul on the MXU: contract D with D directly,
    # result (C, TILE_B) with batch on lanes.  No explicit transpose of W.
    y_t = lax.dot_general(
        w, x,
        dimension_numbers=(((1,), (1,)), ((), ())),
        preferred_element_type=jnp.float32,
    ) + b                                                   # (C, TILE_B)

    # Fused class reductions (sublane sums -> lane-dense (1, TILE_B) result):
    #   out = sum((y - sum(y)/10)^2)/10
    #       = 0.1*sum(y^2) - (0.02 - 0.001*C)*sum(y)^2
    # For C == 10 this is 0.1*S2 - (0.1*S1)^2.  Coefficient is a compile-time
    # Python constant.
    C = y_t.shape[0]
    coef = (2.0 - 0.1 * C) / 100.0
    s1 = jnp.sum(y_t, axis=0, keepdims=True)                # (1, TILE_B)
    s2 = jnp.sum(y_t * y_t, axis=0, keepdims=True)          # (1, TILE_B)
    o_ref[...] = (INV_TEN * s2 - coef * (s1 * s1)).astype(o_ref.dtype)


def variance_none_wrapper(x, w, b, tile_b=8192):
    """x: (B, D_in) f32, w: (C, D_in) f32, b: (C,) f32 -> (B, 1) f32.

    tile_b=8192 keeps the double-buffered x stream at 2 x 4 MiB of VMEM
    (D pads to 128 lanes), inside every generation's scoped VMEM default.
    """
    B, D = x.shape
    C, _ = w.shape

    # Lane-dense output width: pad ONLY the output (cheap, sliced off below).
    # x itself is NOT padded -- ragged last blocks are handled by Pallas.
    Bp = _round_up(B, 128)

    # Batch tile: multiple of 128 so (1, TILE_B) output stores are lane-dense.
    tb = min(tile_b, Bp)
    # Keep >= 2 grid steps when the batch is big enough, so v7x megacore can
    # shard the "parallel" batch axis across both TensorCores.
    if tb == Bp and Bp >= 2048:
        tb = _round_up((Bp + 1) // 2, 128)
    grid_b = pl.cdiv(Bp, tb)

    b2 = b.reshape(C, 1)

    cost = pl.CostEstimate(
        flops=2 * B * C * D + 5 * B * C,
        transcendentals=0,
        bytes_accessed=(B * D + C * D + C + Bp) * 4,
    )

    out_t = pl.pallas_call(
        _variance_wrapper_kernel,
        out_shape=jax.ShapeDtypeStruct((1, Bp), jnp.float32),
        grid_spec=pltpu.PrefetchScalarGridSpec(
            num_scalar_prefetch=0,
            grid=(grid_b,),
            in_specs=[
                pl.BlockSpec((tb, D), lambda i: (i, 0)),   # x: streamed per tile
                pl.BlockSpec((C, D), lambda i: (0, 0)),    # W: VMEM-resident
                pl.BlockSpec((C, 1), lambda i: (0, 0)),    # b: VMEM-resident
            ],
            out_specs=pl.BlockSpec((1, tb), lambda i: (0, i)),  # lane-dense
        ),
        compiler_params=pltpu.CompilerParams(
            dimension_semantics=("parallel",),
        ),
        cost_estimate=cost,
    )(x, w, b2)

    # (1, Bp) -> (B, 1), dropping the padded output lanes.
    return out_t.reshape(Bp, 1)[:B]


def _reference(x, w, b):
    # Subtract-then-square form, exactly as the PyTorch module computes it.
    y = x @ w.T + b
    y = y - jnp.sum(y, axis=1, keepdims=True) / 10.0
    return jnp.sum(y * y, axis=1, keepdims=True) / 10.0


if __name__ == "__main__":
    key = jax.random.PRNGKey(0)
    kx, kw, kb = jax.random.split(key, 3)

    # Small shapes consistent with the module: Linear(D_IN -> 10) inner model.
    # B = 200 exercises the ragged-last-block path (block rounds to 256 rows).
    B, D_IN = 200, 32
    x = jax.random.normal(kx, (B, D_IN), dtype=jnp.float32)
    w = jax.random.normal(kw, (NUM_CLASSES, D_IN), dtype=jnp.float32) * 0.1
    b = jax.random.normal(kb, (NUM_CLASSES,), dtype=jnp.float32) * 0.1

    out = jax.block_until_ready(variance_none_wrapper(x, w, b))
    ref = _reference(x, w, b)
    assert out.shape == (B, 1), out.shape
    assert jnp.allclose(out, ref, atol=1e-4, rtol=1e-4), (out, ref)

    # Also exercise the multi-step grid (>= 2 blocks, v7x megacore split) with
    # a ragged final block.
    B2 = 2176
    x2 = jax.random.normal(kx, (B2, D_IN), dtype=jnp.float32)
    out2 = jax.block_until_ready(variance_none_wrapper(x2, w, b))
    ref2 = _reference(x2, w, b)
    assert out2.shape == (B2, 1), out2.shape
    assert jnp.allclose(out2, ref2, atol=1e-4, rtol=1e-4), (out2, ref2)

    print("KERNEL_OK")
</pallas_src>

<mosaic_0001>
module attributes {stable_mosaic.version = 11 : i64} {
  func.func @_variance_wrapper_kernel(%arg0: i32, %arg1: memref<256x32xf32, #tpu.memory_space<vmem>>, %arg2: memref<10x32xf32, #tpu.memory_space<vmem>>, %arg3: memref<10x1xf32, #tpu.memory_space<vmem>>, %arg4: memref<1x256xf32, #tpu.memory_space<vmem>>) attributes {dimension_semantics = [#tpu.dimension_semantics<parallel>], iteration_bounds = array<i64: 1>, scalar_prefetch = 0 : i64, scratch_operands = 0 : i64, tpu.core_type = #tpu.core_type<tc>, window_params = [{transform_indices = @transform_0, window_bounds = array<i64: 256, 32>}, {pipeline_mode = #tpu.pipeline_mode<synchronous>, transform_indices = @transform_1, window_bounds = array<i64: 10, 32>}, {pipeline_mode = #tpu.pipeline_mode<synchronous>, transform_indices = @transform_2, window_bounds = array<i64: 10, 1>}, {transform_indices = @transform_3, window_bounds = array<i64: 1, 256>}]} {
    %c0 = arith.constant 0 : index
    %c0_0 = arith.constant 0 : index
    %0 = vector.load %arg1[%c0, %c0_0] : memref<256x32xf32, #tpu.memory_space<vmem>>, vector<256x32xf32>
    %c0_1 = arith.constant 0 : index
    %c0_2 = arith.constant 0 : index
    %1 = vector.load %arg2[%c0_1, %c0_2] : memref<10x32xf32, #tpu.memory_space<vmem>>, vector<10x32xf32>
    %c0_3 = arith.constant 0 : index
    %c0_4 = arith.constant 0 : index
    %2 = vector.load %arg3[%c0_3, %c0_4] : memref<10x1xf32, #tpu.memory_space<vmem>>, vector<10x1xf32>
    %cst = arith.constant dense<0.000000e+00> : vector<10x256xf32>
    %3 = tpu.matmul %1, %0, %cst {dimension_numbers = #tpu.dot_dimension_numbers<[1], [1], [0], [0], [0, 0, 1, 0], [], []>} : vector<10x32xf32>, vector<256x32xf32>, vector<10x256xf32> -> vector<10x256xf32>
    %4 = vector.broadcast %2 : vector<10x1xf32> to vector<10x256xf32>
    %5 = arith.addf %3, %4 : vector<10x256xf32>
    %cst_5 = arith.constant dense<0.000000e+00> : vector<256xf32>
    %6 = vector.multi_reduction <add>, %5, %cst_5 [0] : vector<10x256xf32> to vector<256xf32>
    %7 = vector.shape_cast %6 : vector<256xf32> to vector<1x256xf32>
    %8 = arith.mulf %5, %5 : vector<10x256xf32>
    %cst_6 = arith.constant dense<0.000000e+00> : vector<256xf32>
    %9 = vector.multi_reduction <add>, %8, %cst_6 [0] : vector<10x256xf32> to vector<256xf32>
    %10 = vector.shape_cast %9 : vector<256xf32> to vector<1x256xf32>
    %cst_7 = arith.constant 1.000000e-01 : f32
    %11 = vector.broadcast %cst_7 : f32 to vector<1x256xf32>
    %12 = arith.mulf %11, %10 : vector<1x256xf32>
    %13 = arith.mulf %7, %7 : vector<1x256xf32>
    %cst_8 = arith.constant 0.00999999977 : f32
    %14 = vector.broadcast %cst_8 : f32 to vector<1x256xf32>
    %15 = arith.mulf %14, %13 : vector<1x256xf32>
    %16 = arith.subf %12, %15 : vector<1x256xf32>
    %c0_9 = arith.constant 0 : index
    %c0_10 = arith.constant 0 : index
    %17 = vector.load %arg4[%c0_9, %c0_10] : memref<1x256xf32, #tpu.memory_space<vmem>>, vector<1x256xf32>
    tpu.vector_store %arg4[%c0_9, %c0_10], %16 {strides = array<i32>} : memref<1x256xf32, #tpu.memory_space<vmem>>, vector<1x256xf32>,
    return
  }
  func.func @transform_0(%arg0: i32) -> (i32, i32) {
    %c0_i32 = arith.constant 0 : i32
    %c0_i32_0 = arith.constant 0 : i32
    return %arg0, %c0_i32 : i32, i32
  }
  func.func @transform_1(%arg0: i32) -> (i32, i32) {
    %c0_i32 = arith.constant 0 : i32
    %c0_i32_0 = arith.constant 0 : i32
    %c0_i32_1 = arith.constant 0 : i32
    return %c0_i32, %c0_i32_0 : i32, i32
  }
  func.func @transform_2(%arg0: i32) -> (i32, i32) {
    %c0_i32 = arith.constant 0 : i32
    %c0_i32_0 = arith.constant 0 : i32
    %c0_i32_1 = arith.constant 0 : i32
    return %c0_i32, %c0_i32_0 : i32, i32
  }
  func.func @transform_3(%arg0: i32) -> (i32, i32) {
    %c0_i32 = arith.constant 0 : i32
    %c0_i32_0 = arith.constant 0 : i32
    return %c0_i32, %arg0 : i32, i32
  }
}

</mosaic_0001>

<bundles_post_ra>
// kernel: tpu_custom_call.1
= control target key start
LH: loop header
LB: loop body
LE: loop exit
PB: predicated region body
PF: predicated region fallthrough
CT: control target
= control target key end

     0   :  { %vm61_vm0 = vcmask 261120   ;;  %v485_v7 = vmov 0   ;;  %s714_s0 = inlined_call_operand.vmem [shape: f32[200,32], index: 0, kind: input, shape index: {}]   ;;  %s715_s1 = inlined_call_operand.vmem [shape: f32[10,32], index: 1, kind: input, shape index: {}]   ;;  %s716_s2 = inlined_call_operand.vmem [shape: f32[10,1], index: 2, kind: input, shape index: {}]   ;;  %s717_s3 = inlined_call_operand.hbm [shape: f32[1,256], index: 3, kind: output, shape index: {}]  }
   0x1   :  { %v31_v0 = vld [vmem:[%s714_s0 + $0x80] sm:$0xff]  ;;  %v32_v1 = vld [vmem:[%s714_s0 + $0x88] sm:$0xff]  ;;  %vm519_vm1 = vmpackc.low %vm61_vm0, %vm61_vm0  ;;  %460 = vset.pattern.permute.xlu0 %v485_v7 }
   0x2   :  { %v15_v2 = vld [vmem:[%s714_s0] sm:$0xff]  ;;  %v393_v3 = vpack.c.bf16 %v32_v1, %v31_v0  ;;  %v16_v5 = vld [vmem:[%s714_s0 + $0x8] sm:$0xff]  ;;  %v33_v6 = vld [vmem:[%s714_s0 + $0x90] sm:$0xff] }
   0x3   :  { %v396_v8 = vpack.c.bf16 %v16_v5, %v15_v2  ;;  %v34_v9 = vld [vmem:[%s714_s0 + $0x98] sm:$0xff]  ;;  %v17_v11 = vld [vmem:[%s714_s0 + $0x10] sm:$0xff]  ;;  %v35_v13 = vld [vmem:[%s714_s0 + $0xa0] sm:$0xff] }
   0x4   :  { %395 = vmatprep.subr.msk.bf16.mxu0 %vm519_vm1, %v393_v3  ;;  %441 = vmatprep.subr.msk.bf16.mxu1 %vm519_vm1, %v393_v3  ;;  %v399_v10 = vpack.c.bf16 %v34_v9, %v33_v6  ;;  %v18_v12 = vld [vmem:[%s714_s0 + $0x18] sm:$0xff]  ;;  %v36_v14 = vld [vmem:[%s714_s0 + $0xa8] sm:$0xff]  ;;  %v559_v17 = vld [vmem:[%s715_s1] sm:$0xff] }
   0x5   :  { %398 = vmatpush3.bf16.xpose.msk.msra.mxu0 %vm519_vm1, %v396_v8  ;;  %449 = vmatpush3.bf16.xpose.msk.msra.mxu1 %vm519_vm1, %v396_v8  ;;  %v402_v15 = vpack.c.bf16 %v18_v12, %v17_v11  ;;  %v405_v16 = vpack.c.bf16 %v36_v14, %v35_v13  ;;  %v564_v18 = vld [vmem:[%s715_s1 + $0x8] sm:$0x3] }
   0x6   :  { %401 = vmatprep.subr.msk.bf16.mxu0 %vm519_vm1, %v399_v10  ;;  %442 = vmatprep.subr.msk.bf16.mxu1 %vm519_vm1, %v399_v10  ;;  %v50_v19 = vld [vmem:[%s716_s2 + $0x8] sm:$0x3] }
   0xd   :  { %404 = vmatpush3.bf16.xpose.msk.msra.mxu0 %vm519_vm1, %v402_v15  ;;  %450 = vmatpush3.bf16.xpose.msk.msra.mxu1 %vm519_vm1, %v402_v15 }
   0xe   :  { %8 = vsyncpa [#allocation3], 0  ;;  %407 = vmatprep.subr.msk.bf16.mxu0 %vm519_vm1, %v405_v16  ;;  %443 = vmatprep.subr.msk.bf16.mxu1 %vm519_vm1, %v405_v16  ;;  %v19_v20 = vld [vmem:[%s714_s0 + $0x20] sm:$0xff]  ;;  %v20_v21 = vld [vmem:[%s714_s0 + $0x28] sm:$0xff]  ;;  %vm241_vm2 = vcmask 1041408  }
   0xf   :  { %v37_v22 = vld [vmem:[%s714_s0 + $0xb0] sm:$0xff]  ;;  %v38_v23 = vld [vmem:[%s714_s0 + $0xb8] sm:$0xff]  ;;  %389 = vmatprep.mubr.msk.f32.mxu0 %vm61_vm0, %v559_v17  ;;  %391 = vmatprep.mubr.msk.f32.mxu1 %vm61_vm0, %v564_v18  ;;  %v408_v24 = vpack.c.bf16 %v20_v21, %v19_v20  ;;  %v49_v25 = vld [vmem:[%s716_s2] sm:$0xff] }
  0x10   :  { %58 = vperm.xlu0 %460, %v50_v19   ;;  %v411_v26 = vpack.c.bf16 %v38_v23, %v37_v22  ;;  %v21_v27 = vld [vmem:[%s714_s0 + $0x30] sm:$0xff]  ;;  %v22_v28 = vld [vmem:[%s714_s0 + $0x38] sm:$0xff]  ;;  %v39_v29 = vld [vmem:[%s714_s0 + $0xc0] sm:$0xff] }
  0x11   :  { %v40_v30 = vld [vmem:[%s714_s0 + $0xc8] sm:$0xff]  ;;  %v414_v31 = vpack.c.bf16 %v22_v28, %v21_v27  ;;  %v23_v33 = vld [vmem:[%s714_s0 + $0x40] sm:$0xff]  ;;  %v41_v35 = vld [vmem:[%s714_s0 + $0xd0] sm:$0xff] }
  0x12   :  { %v417_v32 = vpack.c.bf16 %v40_v30, %v39_v29  ;;  %v24_v34 = vld [vmem:[%s714_s0 + $0x48] sm:$0xff]  ;;  %v42_v36 = vld [vmem:[%s714_s0 + $0xd8] sm:$0xff]  ;;  %v25_v39 = vld [vmem:[%s714_s0 + $0x50] sm:$0xff]  ;;  %v486_v30 = vmov 1966171168  }
  0x13   :  { %v420_v37 = vpack.c.bf16 %v24_v34, %v23_v33  ;;  %v423_v38 = vpack.c.bf16 %v42_v36, %v41_v35  ;;  %v26_v40 = vld [vmem:[%s714_s0 + $0x58] sm:$0xff]  ;;  %v43_v41 = vld [vmem:[%s714_s0 + $0xe0] sm:$0xff]  ;;  %v44_v42 = vld [vmem:[%s714_s0 + $0xe8] sm:$0xff] }
  0x14   :  { %53 = vperm.xlu0 %460, %v49_v25   ;;  %v426_v43 = vpack.c.bf16 %v26_v40, %v25_v39  ;;  %v429_v44 = vpack.c.bf16 %v44_v42, %v43_v41  ;;  %v27_v45 = vld [vmem:[%s714_s0 + $0x60] sm:$0xff]  ;;  %v28_v46 = vld [vmem:[%s714_s0 + $0x68] sm:$0xff]  ;;  %v45_v47 = vld [vmem:[%s714_s0 + $0xf0] sm:$0xff] }
  0x15   :  { %410 = vmatpush3.bf16.xpose.msk.msra.mxu0 %vm519_vm1, %v408_v24  ;;  %451 = vmatpush3.bf16.xpose.msk.msra.mxu1 %vm519_vm1, %v408_v24  ;;  %v46_v48 = vld [vmem:[%s714_s0 + $0xf8] sm:$0xff]  ;;  %v432_v49 = vpack.c.bf16 %v28_v46, %v27_v45  ;;  %v29_v51 = vld [vmem:[%s714_s0 + $0x70] sm:$0xff] }
  0x16   :  { %413 = vmatprep.subr.msk.bf16.mxu0 %vm519_vm1, %v411_v26  ;;  %444 = vmatprep.subr.msk.bf16.mxu1 %vm519_vm1, %v411_v26  ;;  %v435_v50 = vpack.c.bf16 %v46_v48, %v45_v47  ;;  %v30_v52 = vld [vmem:[%s714_s0 + $0x78] sm:$0xff]  ;;  %s487_s0 = smov [#allocation2]  }
  0x17   :  { %v438_v53 = vpack.c.bf16 %v30_v52, %v29_v51  ;;  %s315_s26 = sshll.u32 %s487_s0, 4  ;;  %s316_s26 = int_to_ptr.vmem [resolvable:$true] %s315_s26 }
  0x18   :  { %s461_s27 = scalar_lea.vmem %s316_s26, 32  ;;  %p466_p1 = scmp.lt.s32.totalorder %s316_s26, %s316_s26 }
  0x19   :  { %p462_p0 = scmp.ne.s32.totalorder %s316_s26, %s461_s27  ;;  %p467_p2 = scmp.lt.s32.totalorder %s461_s27, %s461_s27 }
  0x1b   :  { %p468_p3 = por %p467_p2, %p466_p1 }
  0x1d   :  { %416 = vmatpush3.bf16.xpose.msk.msra.mxu0 %vm519_vm1, %v414_v31  ;;  %452 = vmatpush3.bf16.xpose.msk.msra.mxu1 %vm519_vm1, %v414_v31  ;;  %v290_v31 = vunpack.c.l.s4 %v486_v30  ;;  %p469_p4 = pnand %p468_p3, %p462_p0 }
  0x1e   :  { %419 = vmatprep.subr.msk.bf16.mxu0 %vm519_vm1, %v417_v32  ;;  %445 = vmatprep.subr.msk.bf16.mxu1 %vm519_vm1, %v417_v32  ;;  %v292_v32 = vlaneseq }
  0x1f   :  { %v291_v41 = vunpack.c.0.s8 %v290_v31 }
  0x20   :  { %v293_v42 = vshrl.u32 %v292_v32, 7  ;;  %vm306_vm3 = vcmp.lt.s32.totalorder %v292_v32, 256 }
  0x25   :  { %422 = vmatpush3.bf16.xpose.msk.msra.mxu0 %vm519_vm1, %v420_v37  ;;  %453 = vmatpush3.bf16.xpose.msk.msra.mxu1 %vm519_vm1, %v420_v37 }
  0x26   :  { %425 = vmatprep.subr.msk.bf16.mxu0 %vm519_vm1, %v423_v38  ;;  %446 = vmatprep.subr.msk.bf16.mxu1 %vm519_vm1, %v423_v38 }
  0x2d   :  { %428 = vmatpush3.bf16.xpose.msk.msra.mxu0 %vm519_vm1, %v426_v43  ;;  %454 = vmatpush3.bf16.xpose.msk.msra.mxu1 %vm519_vm1, %v426_v43 }
  0x2e   :  { %431 = vmatprep.subr.msk.bf16.mxu0 %vm519_vm1, %v429_v44  ;;  %447 = vmatprep.subr.msk.bf16.mxu1 %vm519_vm1, %v429_v44 }
  0x35   :  { %434 = vmatpush3.bf16.xpose.msk.msra.mxu0 %vm519_vm1, %v432_v49  ;;  %455 = vmatpush3.bf16.xpose.msk.msra.mxu1 %vm519_vm1, %v432_v49  ;;  %v294_v49 = vsub.s32 %v291_v41, %v293_v42 }
  0x36   :  { %437 = vmatprep.subr.msk.bf16.mxu0 %vm519_vm1, %v435_v50  ;;  %448 = vmatprep.subr.msk.bf16.mxu1 %vm519_vm1, %v435_v50 }
  0x3d   :  { %440 = vmatpush3.bf16.xpose.msk.msra.mxu0 %vm519_vm1, %v438_v53  ;;  %456 = vmatpush3.bf16.xpose.msk.msra.mxu1 %vm519_vm1, %v438_v53 }
  0x44   :  { %390 = vmatmul.mubr.msk.f32.vlgmr.msra.gmra.mrb[0].mxu0 %vm61_vm0, %v559_v17  ;;  %392 = vmatmul.mubr.msk.f32.vlgmr.msra.gmra.mrb[0].mxu1 %vm61_vm0, %v564_v18 }
  0x8f   :  { %v59_v54 = vpop.permute.xlu0 %58 }
  0x93   :  { %v54_v55 = vpop.permute.xlu0 %53 }
 0x117   :  { %v230_v56 = vpop.f32.mrb[0].mxu0  ;;  %v236_v57 = vpop.f32.mrb[0].mxu1 }
 0x118   :  { %v231_v58 = vadd.f32 %v230_v56, %v54_v55  ;;  %v237_v59 = vadd.f32 %v236_v57, %v59_v54  ;;  %v232_v60 = vpop.f32.mrb[1].mxu0  ;;  %v238_v61 = vpop.f32.mrb[1].mxu1 }
 0x119   :  { %v233_v62 = vadd.f32 %v232_v60, %v54_v55  ;;  %v239_v63 = vadd.f32 %v238_v61, %v59_v54 }
 0x11a   :  { %v258_v0 = vmul.f32 %v231_v58, %v231_v58  ;;  %v242_v1 = vsel %vm241_vm2, %v237_v59, 0.0  ;;  %v260_v2 = vmul.f32 %v237_v59, %v237_v59 }
 0x11b   :  { %v243_v3 = vadd.f32 %v242_v1, %v231_v58  ;;  %v259_v4 = vmul.f32 %v233_v62, %v233_v62  ;;  %v250_v5 = vsel %vm241_vm2, %v239_v63, 0.0  ;;  %v261_v6 = vmul.f32 %v239_v63, %v239_v63 }
 0x11c   :  { %v262_v7 = vsel %vm241_vm2, %v260_v2, 0.0  ;;  %v251_v8 = vadd.f32 %v250_v5, %v233_v62 }
 0x11d   :  { %v244_v9 = vrot.slane %v243_v3, 4  ;;  %v263_v10 = vadd.f32 %v262_v7, %v258_v0  ;;  %v270_v11 = vsel %vm241_vm2, %v261_v6, 0.0 }
 0x11e   :  { %v252_v12 = vrot.slane %v251_v8, 4  ;;  %v271_v13 = vadd.f32 %v270_v11, %v259_v4 }
 0x11f   :  { %v245_v14 = vadd.f32 %v244_v9, %v243_v3  ;;  %v264_v15 = vrot.slane %v263_v10, 4 }
 0x120   :  { %v253_v16 = vadd.f32 %v252_v12, %v251_v8  ;;  %v272_v17 = vrot.slane %v271_v13, 4 }
 0x121   :  { %v246_v18 = vrot.slane %v245_v14, 2  ;;  %v265_v19 = vadd.f32 %v264_v15, %v263_v10 }
 0x122   :  { %v254_v20 = vrot.slane %v253_v16, 2  ;;  %v273_v21 = vadd.f32 %v272_v17, %v271_v13 }
 0x123   :  { %v247_v22 = vadd.f32 %v246_v18, %v245_v14  ;;  %v266_v23 = vrot.slane %v265_v19, 2 }
 0x124   :  { %v255_v24 = vadd.f32 %v254_v20, %v253_v16  ;;  %v274_v25 = vrot.slane %v273_v21, 2 }
 0x125   :  { %v248_v26 = vrot.slane %v247_v22, 1  ;;  %v267_v27 = vadd.f32 %v266_v23, %v265_v19 }
 0x126   :  { %v256_v28 = vrot.slane %v255_v24, 1  ;;  %v275_v29 = vadd.f32 %v274_v25, %v273_v21 }
 0x127   :  { %v249_v33 = vadd.f32 %v248_v26, %v247_v22  ;;  %v268_v34 = vrot.slane %v267_v27, 1 }
 0x128   :  { %v257_v35 = vadd.f32 %v256_v28, %v255_v24  ;;  %v276_v36 = vrot.slane %v275_v29, 1 }
 0x129   :  { %v269_v37 = vadd.f32 %v268_v34, %v267_v27  ;;  %v280_v38 = vmul.f32 %v249_v33, %v249_v33 }
 0x12a   :  { %v277_v39 = vadd.f32 %v276_v36, %v275_v29  ;;  %v281_v40 = vmul.f32 %v257_v35, %v257_v35 }
 0x12b   :  { %v282_v43 = vmul.f32 0.01, %v280_v38  ;;  %v278_v44 = vmul.f32 0.1, %v269_v37 }
 0x12c   :  { %v283_v45 = vmul.f32 0.01, %v281_v40  ;;  %v279_v46 = vmul.f32 0.1, %v277_v39 }
 0x12d   :  { %v284_v47 = vsub.f32 %v278_v44, %v282_v43 }
 0x12e   :  { %v285_v48 = vsub.f32 %v279_v46, %v283_v45 }
 0x130   :  { %v288_v50 = vcombine.low %v284_v47, %v285_v48 }
 0x132   :  { %v295_v51 = vrot.slane %v288_v50, %v294_v49 }
 0x134   :  { %v302_v52 = vrot.slane %v295_v51, %v294_v49 }
 0x136   :  { %308 = vst.msk [vmem:[#allocation2] sm:$0x3] %vm306_vm3, %v302_v52 }
 0x137   :  { %472 = shalt.err (!%p469_p4)
}
 0x138   :  { %s473_s30 = scalar_lea.hbm %s717_s3, 32 }
 0x139   :  { %p474_p5 = scmp.ne.s32.totalorder %s717_s3, %s473_s30  ;;  %p477_p6 = scmp.lt.u32.totalorder %s473_s30, %s717_s3 }
 0x13b   :  { %p479_p7 = pnand %p477_p6, %p474_p5 }
 0x13d   :  { %482 = shalt.err (!%p479_p7)
}
 0x13e   :  { %318 = dma.vmem_to_hbm [thread:$0]  %s316_s26, 32, %s717_s3, [#allocation3]  }
 0x13f   :  { %483 = dma.done.wait [#allocation3], 32  }
 0x140   :  { %484 = vsyncadd [#allocation3], 4294967264 }
 0x141   :  { %322 = vsyncpa [#allocation3], 1 }

</bundles_post_ra>
